<compile_context>
chip_gen: v7x
topology: tpu7x:2x2x1
jax: 0.10.0
libtpu: 0.0.40
codegen_flags: <defaults>
</compile_context>

<pallas_src>
import functools

import jax
import jax.numpy as jnp
import numpy as np
from jax.experimental import pallas as pl
from jax.experimental.pallas import tpu as pltpu


_LANE_TILE_TARGET = 2048            # 512-2048 lanes reaches ~85% of HBM roofline
_ROW_TILE_CAP = 256                 # max channel rows per block
_BYTES_PER_BUFFER = 2 * 1024 * 1024 # keep each pipeline buffer ~2 MiB


# ----------------------------- Pallas kernel -------------------------------

def _linearspline_kernel(x_ref, p_ref, o_ref, *, size, grid_step, even, half):
    """One (1, bc, bs) tile:  o = (b + s0*xs + sum_k a_k*max(xs, u_k)) * inv_scale.

    x_ref : (1, bc, bs) input tile (rows = channels)
    p_ref : (bc, size+2) per-channel params [b, s0, scale, inv_scale, a_1..a_{size-2}]
    o_ref : (1, bc, bs) output tile
    """
    x = x_ref[0].astype(jnp.float32)        # (bc, bs), compute in f32
    p = p_ref[...]                          # (bc, size+2) -- single hoisted load
    b = p[:, 0:1]                           # (bc, 1) broadcasts over lanes
    s0 = p[:, 1:2]
    scale = p[:, 2:3]
    inv_scale = p[:, 3:4]

    shift = 0.5 * grid_step if even else 0.0
    xs = x * scale
    acc = b + s0 * xs
    # Static unroll over the size-2 interior knots: max + mul + add per knot.
    for k in range(1, size - 1):
        u_k = grid_step * (k - half) + shift        # compile-time constant
        acc = acc + p[:, k + 3:k + 4] * jnp.maximum(xs, u_k)

    o_ref[0] = (acc * inv_scale).astype(o_ref.dtype)


# ------------------------------ JAX wrapper ---------------------------------

def _build_params(coefficients, scaling, *, size, grid_step, even, half):
    """Pack per-channel ReLU-expansion parameters into one (C, size+2) table."""
    C = coefficients.shape[0]
    c = coefficients.astype(jnp.float32)
    shift = 0.5 * grid_step if even else 0.0
    # knot positions t_k = (k - half)*grid, shifted by +grid/2 for even sizes
    knots = (np.arange(size, dtype=np.float64) - half) * grid_step + shift   # (size,)

    c0 = c[:, 0]                                                   # (C,)
    s0 = (c[:, 1] - c[:, 0]) / grid_step                           # (C,)
    a = (c[:, 2:] - 2.0 * c[:, 1:-1] + c[:, :-2]) / grid_step      # (C, size-2) == relu_slopes
    u = jnp.asarray(knots[1:size - 1], dtype=jnp.float32)          # (size-2,)
    # Fold all per-knot constants (and the even-size output shift) into one bias.
    b = c0 - s0 * np.float32(knots[0]) - jnp.sum(a * u[None, :], axis=1) + shift

    scale = scaling.reshape(C).astype(jnp.float32)
    inv_scale = 1.0 / scale                                        # exact wrapper-side reciprocal
    return jnp.concatenate(
        [b[:, None], s0[:, None], scale[:, None], inv_scale[:, None], a], axis=1)


def _choose_tiles(C, S_pad, itemsize):
    """Layout-legal block sizes that divide the (padded) array exactly and keep
    each pipeline buffer under ~2 MiB."""
    # Channel tile: multiple of 8 dividing C (capped), else the full C dim (always legal).
    if C % 8 == 0 and C > _ROW_TILE_CAP:
        bc = 8
        for cand in range(_ROW_TILE_CAP, 7, -8):
            if C % cand == 0:
                bc = cand
                break
    else:
        bc = C
    # Lane tile: largest multiple of 128 dividing S_pad, capped by target and VMEM budget.
    budget = max(128, (_BYTES_PER_BUFFER // max(1, bc * itemsize)) // 128 * 128)
    cap = min(S_pad, _LANE_TILE_TARGET, budget)
    bs = 128
    for cand in range(cap, 127, -128):
        if S_pad % cand == 0:
            bs = cand
            break
    return bc, bs


def linear_spline_forward(x_nchw, coefficients, scaling, *, size, range_):
    """Forward pass of LinearSpline ('conv' mode).  For lipschitz_constrained=True,
    pass the slope-clipped coefficients instead (a tiny host/JAX-side projection)."""
    N, C, H, W = x_nchw.shape
    assert coefficients.shape == (C, size)
    S = H * W
    grid_step = 2.0 * float(range_) / (size - 1)
    even = (size % 2 == 0)
    half = size // 2

    params = _build_params(jnp.asarray(coefficients), jnp.asarray(scaling).reshape(-1),
                           size=size, grid_step=grid_step, even=even, half=half)

    x3 = x_nchw.reshape(N, C, S)
    # Pad lanes to a multiple of 128 so every store is unmasked / lane-dense.
    S_pad = ((S + 127) // 128) * 128
    if S_pad != S:
        x3 = jnp.pad(x3, ((0, 0), (0, 0), (0, S_pad - S)))

    itemsize = jnp.dtype(x3.dtype).itemsize
    bc, bs = _choose_tiles(C, S_pad, itemsize)
    grid = (N, C // bc, S_pad // bs)

    kernel = functools.partial(_linearspline_kernel, size=size, grid_step=grid_step,
                               even=even, half=half)

    out = pl.pallas_call(
        kernel,
        out_shape=jax.ShapeDtypeStruct((N, C, S_pad), x3.dtype),
        grid=grid,
        in_specs=[
            pl.BlockSpec((1, bc, bs), lambda n, ci, si: (n, ci, si)),
            pl.BlockSpec((bc, size + 2), lambda n, ci, si: (ci, 0)),
        ],
        out_specs=pl.BlockSpec((1, bc, bs), lambda n, ci, si: (n, ci, si)),
        compiler_params=pltpu.CompilerParams(
            dimension_semantics=("parallel", "parallel", "parallel"),
            vmem_limit_bytes=32 * 1024 * 1024),
    )(x3, params)

    if S_pad != S:
        out = out[:, :, :S]
    return out.reshape(N, C, H, W)


# --------------------------- pure-JAX reference ------------------------------

def _reference_forward(x, coeff_vect, scaling, *, size, range_, C):
    """Direct transcription of LinearSpline_Func.forward (PyTorch) in JAX."""
    grid_step = 2.0 * float(range_) / (size - 1)
    even = (size % 2 == 0)
    half = size // 2
    zero_knot = jnp.arange(C) * size + half
    scale = scaling.reshape(1, C, 1, 1)

    xs = x * scale
    xe = xs - grid_step / 2 if even else xs
    max_range = grid_step * (half - (2 if even else 1))
    xc = jnp.clip(xe, -grid_step * half, max_range)
    fl = jnp.floor(xc / grid_step)
    fr = xe / grid_step - fl
    idx = (zero_knot.reshape(1, C, 1, 1) + fl).astype(jnp.int32)
    out = coeff_vect[idx + 1] * fr + coeff_vect[idx] * (1.0 - fr)
    if even:
        out = out + grid_step / 2
    return out / scale


# --------------------------------- main --------------------------------------

if __name__ == "__main__":
    key = jax.random.PRNGKey(0)
    k_x, k_c, k_s, k_x2 = jax.random.split(key, 4)

    # ---- primary check: module defaults (mode='conv', init='relu', odd size) ----
    num_activations = 4          # C
    size = 21                    # odd -> even=False
    range_ = 2.0

    grid_tensor = jnp.broadcast_to(
        jnp.linspace(-range_, range_, size, dtype=jnp.float32),
        (num_activations, size))
    coefficients = jnp.maximum(grid_tensor, 0.0)                  # init == 'relu'
    scaling = jnp.ones((num_activations,), dtype=jnp.float32)     # scaling_coeffs_vect

    x = 1.5 * jax.random.normal(k_x, (2, num_activations, 16, 16), dtype=jnp.float32)

    out = linear_spline_forward(x, coefficients, scaling, size=size, range_=range_)
    out = jax.block_until_ready(out)
    ref = _reference_forward(x, coefficients.reshape(-1), scaling,
                             size=size, range_=range_, C=num_activations)
    # atol 1e-4: the ReLU expansion accumulates ~size f32 terms, so ~1e-5-level
    # roundoff vs. the gather/lerp reference is expected; real logic errors would
    # be >= O(grid_step).
    np.testing.assert_allclose(np.asarray(out), np.asarray(ref), rtol=1e-5, atol=1e-4)

    # ---- secondary check: even size, non-128-multiple spatial (exercises lane
    # padding), perturbed coefficients and non-unit per-channel scaling ----
    C2, size2, range2 = 6, 8, 1.0
    gt2 = jnp.broadcast_to(jnp.linspace(-range2, range2, size2, dtype=jnp.float32),
                           (C2, size2))
    coeffs2 = jnp.abs(gt2) + 0.05 * jax.random.normal(k_c, (C2, size2), dtype=jnp.float32)
    scaling2 = 0.5 + jax.random.uniform(k_s, (C2,), dtype=jnp.float32)
    x2 = 2.0 * jax.random.normal(k_x2, (3, C2, 7, 9), dtype=jnp.float32)

    out2 = jax.block_until_ready(
        linear_spline_forward(x2, coeffs2, scaling2, size=size2, range_=range2))
    ref2 = _reference_forward(x2, coeffs2.reshape(-1), scaling2,
                              size=size2, range_=range2, C=C2)
    np.testing.assert_allclose(np.asarray(out2), np.asarray(ref2), rtol=1e-5, atol=1e-4)

    print("KERNEL_OK")
</pallas_src>

<mosaic_0001>
module attributes {stable_mosaic.version = 11 : i64} {
  func.func @_linearspline_kernel(%arg0: i32, %arg1: i32, %arg2: i32, %arg3: memref<1x4x256xf32, #tpu.memory_space<vmem>>, %arg4: memref<4x23xf32, #tpu.memory_space<vmem>>, %arg5: memref<1x4x256xf32, #tpu.memory_space<vmem>>) attributes {dimension_semantics = [#tpu.dimension_semantics<parallel>, #tpu.dimension_semantics<parallel>, #tpu.dimension_semantics<parallel>], iteration_bounds = array<i64: 2, 1, 1>, scalar_prefetch = 0 : i64, scratch_operands = 0 : i64, tpu.core_type = #tpu.core_type<tc>, window_params = [{transform_indices = @transform_0, window_bounds = array<i64: 1, 4, 256>}, {transform_indices = @transform_1, window_bounds = array<i64: 4, 23>}, {transform_indices = @transform_2, window_bounds = array<i64: 1, 4, 256>}]} {
    %c0 = arith.constant 0 : index
    %c0_0 = arith.constant 0 : index
    %c0_1 = arith.constant 0 : index
    %0 = vector.load %arg3[%c0, %c0_0, %c0_1] : memref<1x4x256xf32, #tpu.memory_space<vmem>>, vector<1x4x256xf32>
    %1 = vector.shape_cast %0 : vector<1x4x256xf32> to vector<4x256xf32>
    %c0_2 = arith.constant 0 : index
    %c0_3 = arith.constant 0 : index
    %2 = vector.load %arg4[%c0_2, %c0_3] : memref<4x23xf32, #tpu.memory_space<vmem>>, vector<4x23xf32>
    %3 = vector.extract_strided_slice %2 {offsets = [0, 0], sizes = [4, 1], strides = [1, 1]} : vector<4x23xf32> to vector<4x1xf32>
    %4 = vector.extract_strided_slice %2 {offsets = [0, 1], sizes = [4, 1], strides = [1, 1]} : vector<4x23xf32> to vector<4x1xf32>
    %5 = vector.extract_strided_slice %2 {offsets = [0, 2], sizes = [4, 1], strides = [1, 1]} : vector<4x23xf32> to vector<4x1xf32>
    %6 = vector.extract_strided_slice %2 {offsets = [0, 3], sizes = [4, 1], strides = [1, 1]} : vector<4x23xf32> to vector<4x1xf32>
    %7 = vector.broadcast %5 : vector<4x1xf32> to vector<4x256xf32>
    %8 = arith.mulf %1, %7 : vector<4x256xf32>
    %9 = vector.broadcast %4 : vector<4x1xf32> to vector<4x256xf32>
    %10 = arith.mulf %9, %8 : vector<4x256xf32>
    %11 = vector.broadcast %3 : vector<4x1xf32> to vector<4x256xf32>
    %12 = arith.addf %11, %10 : vector<4x256xf32>
    %13 = vector.extract_strided_slice %2 {offsets = [0, 4], sizes = [4, 1], strides = [1, 1]} : vector<4x23xf32> to vector<4x1xf32>
    %cst = arith.constant -1.800000e+00 : f32
    %14 = vector.broadcast %cst : f32 to vector<4x256xf32>
    %15 = arith.maximumf %8, %14 : vector<4x256xf32>
    %16 = vector.broadcast %13 : vector<4x1xf32> to vector<4x256xf32>
    %17 = arith.mulf %16, %15 : vector<4x256xf32>
    %18 = arith.addf %12, %17 : vector<4x256xf32>
    %19 = vector.extract_strided_slice %2 {offsets = [0, 5], sizes = [4, 1], strides = [1, 1]} : vector<4x23xf32> to vector<4x1xf32>
    %cst_4 = arith.constant -1.600000e+00 : f32
    %20 = vector.broadcast %cst_4 : f32 to vector<4x256xf32>
    %21 = arith.maximumf %8, %20 : vector<4x256xf32>
    %22 = vector.broadcast %19 : vector<4x1xf32> to vector<4x256xf32>
    %23 = arith.mulf %22, %21 : vector<4x256xf32>
    %24 = arith.addf %18, %23 : vector<4x256xf32>
    %25 = vector.extract_strided_slice %2 {offsets = [0, 6], sizes = [4, 1], strides = [1, 1]} : vector<4x23xf32> to vector<4x1xf32>
    %cst_5 = arith.constant -1.400000e+00 : f32
    %26 = vector.broadcast %cst_5 : f32 to vector<4x256xf32>
    %27 = arith.maximumf %8, %26 : vector<4x256xf32>
    %28 = vector.broadcast %25 : vector<4x1xf32> to vector<4x256xf32>
    %29 = arith.mulf %28, %27 : vector<4x256xf32>
    %30 = arith.addf %24, %29 : vector<4x256xf32>
    %31 = vector.extract_strided_slice %2 {offsets = [0, 7], sizes = [4, 1], strides = [1, 1]} : vector<4x23xf32> to vector<4x1xf32>
    %cst_6 = arith.constant -1.200000e+00 : f32
    %32 = vector.broadcast %cst_6 : f32 to vector<4x256xf32>
    %33 = arith.maximumf %8, %32 : vector<4x256xf32>
    %34 = vector.broadcast %31 : vector<4x1xf32> to vector<4x256xf32>
    %35 = arith.mulf %34, %33 : vector<4x256xf32>
    %36 = arith.addf %30, %35 : vector<4x256xf32>
    %37 = vector.extract_strided_slice %2 {offsets = [0, 8], sizes = [4, 1], strides = [1, 1]} : vector<4x23xf32> to vector<4x1xf32>
    %cst_7 = arith.constant -1.000000e+00 : f32
    %38 = vector.broadcast %cst_7 : f32 to vector<4x256xf32>
    %39 = arith.maximumf %8, %38 : vector<4x256xf32>
    %40 = vector.broadcast %37 : vector<4x1xf32> to vector<4x256xf32>
    %41 = arith.mulf %40, %39 : vector<4x256xf32>
    %42 = arith.addf %36, %41 : vector<4x256xf32>
    %43 = vector.extract_strided_slice %2 {offsets = [0, 9], sizes = [4, 1], strides = [1, 1]} : vector<4x23xf32> to vector<4x1xf32>
    %cst_8 = arith.constant -8.000000e-01 : f32
    %44 = vector.broadcast %cst_8 : f32 to vector<4x256xf32>
    %45 = arith.maximumf %8, %44 : vector<4x256xf32>
    %46 = vector.broadcast %43 : vector<4x1xf32> to vector<4x256xf32>
    %47 = arith.mulf %46, %45 : vector<4x256xf32>
    %48 = arith.addf %42, %47 : vector<4x256xf32>
    %49 = vector.extract_strided_slice %2 {offsets = [0, 10], sizes = [4, 1], strides = [1, 1]} : vector<4x23xf32> to vector<4x1xf32>
    %cst_9 = arith.constant -6.000000e-01 : f32
    %50 = vector.broadcast %cst_9 : f32 to vector<4x256xf32>
    %51 = arith.maximumf %8, %50 : vector<4x256xf32>
    %52 = vector.broadcast %49 : vector<4x1xf32> to vector<4x256xf32>
    %53 = arith.mulf %52, %51 : vector<4x256xf32>
    %54 = arith.addf %48, %53 : vector<4x256xf32>
    %55 = vector.extract_strided_slice %2 {offsets = [0, 11], sizes = [4, 1], strides = [1, 1]} : vector<4x23xf32> to vector<4x1xf32>
    %cst_10 = arith.constant -4.000000e-01 : f32
    %56 = vector.broadcast %cst_10 : f32 to vector<4x256xf32>
    %57 = arith.maximumf %8, %56 : vector<4x256xf32>
    %58 = vector.broadcast %55 : vector<4x1xf32> to vector<4x256xf32>
    %59 = arith.mulf %58, %57 : vector<4x256xf32>
    %60 = arith.addf %54, %59 : vector<4x256xf32>
    %61 = vector.extract_strided_slice %2 {offsets = [0, 12], sizes = [4, 1], strides = [1, 1]} : vector<4x23xf32> to vector<4x1xf32>
    %cst_11 = arith.constant -2.000000e-01 : f32
    %62 = vector.broadcast %cst_11 : f32 to vector<4x256xf32>
    %63 = arith.maximumf %8, %62 : vector<4x256xf32>
    %64 = vector.broadcast %61 : vector<4x1xf32> to vector<4x256xf32>
    %65 = arith.mulf %64, %63 : vector<4x256xf32>
    %66 = arith.addf %60, %65 : vector<4x256xf32>
    %67 = vector.extract_strided_slice %2 {offsets = [0, 13], sizes = [4, 1], strides = [1, 1]} : vector<4x23xf32> to vector<4x1xf32>
    %cst_12 = arith.constant 0.000000e+00 : f32
    %68 = vector.broadcast %cst_12 : f32 to vector<4x256xf32>
    %69 = arith.maximumf %8, %68 : vector<4x256xf32>
    %70 = vector.broadcast %67 : vector<4x1xf32> to vector<4x256xf32>
    %71 = arith.mulf %70, %69 : vector<4x256xf32>
    %72 = arith.addf %66, %71 : vector<4x256xf32>
    %73 = vector.extract_strided_slice %2 {offsets = [0, 14], sizes = [4, 1], strides = [1, 1]} : vector<4x23xf32> to vector<4x1xf32>
    %cst_13 = arith.constant 2.000000e-01 : f32
    %74 = vector.broadcast %cst_13 : f32 to vector<4x256xf32>
    %75 = arith.maximumf %8, %74 : vector<4x256xf32>
    %76 = vector.broadcast %73 : vector<4x1xf32> to vector<4x256xf32>
    %77 = arith.mulf %76, %75 : vector<4x256xf32>
    %78 = arith.addf %72, %77 : vector<4x256xf32>
    %79 = vector.extract_strided_slice %2 {offsets = [0, 15], sizes = [4, 1], strides = [1, 1]} : vector<4x23xf32> to vector<4x1xf32>
    %cst_14 = arith.constant 4.000000e-01 : f32
    %80 = vector.broadcast %cst_14 : f32 to vector<4x256xf32>
    %81 = arith.maximumf %8, %80 : vector<4x256xf32>
    %82 = vector.broadcast %79 : vector<4x1xf32> to vector<4x256xf32>
    %83 = arith.mulf %82, %81 : vector<4x256xf32>
    %84 = arith.addf %78, %83 : vector<4x256xf32>
    %85 = vector.extract_strided_slice %2 {offsets = [0, 16], sizes = [4, 1], strides = [1, 1]} : vector<4x23xf32> to vector<4x1xf32>
    %cst_15 = arith.constant 6.000000e-01 : f32
    %86 = vector.broadcast %cst_15 : f32 to vector<4x256xf32>
    %87 = arith.maximumf %8, %86 : vector<4x256xf32>
    %88 = vector.broadcast %85 : vector<4x1xf32> to vector<4x256xf32>
    %89 = arith.mulf %88, %87 : vector<4x256xf32>
    %90 = arith.addf %84, %89 : vector<4x256xf32>
    %91 = vector.extract_strided_slice %2 {offsets = [0, 17], sizes = [4, 1], strides = [1, 1]} : vector<4x23xf32> to vector<4x1xf32>
    %cst_16 = arith.constant 8.000000e-01 : f32
    %92 = vector.broadcast %cst_16 : f32 to vector<4x256xf32>
    %93 = arith.maximumf %8, %92 : vector<4x256xf32>
    %94 = vector.broadcast %91 : vector<4x1xf32> to vector<4x256xf32>
    %95 = arith.mulf %94, %93 : vector<4x256xf32>
    %96 = arith.addf %90, %95 : vector<4x256xf32>
    %97 = vector.extract_strided_slice %2 {offsets = [0, 18], sizes = [4, 1], strides = [1, 1]} : vector<4x23xf32> to vector<4x1xf32>
    %cst_17 = arith.constant 1.000000e+00 : f32
    %98 = vector.broadcast %cst_17 : f32 to vector<4x256xf32>
    %99 = arith.maximumf %8, %98 : vector<4x256xf32>
    %100 = vector.broadcast %97 : vector<4x1xf32> to vector<4x256xf32>
    %101 = arith.mulf %100, %99 : vector<4x256xf32>
    %102 = arith.addf %96, %101 : vector<4x256xf32>
    %103 = vector.extract_strided_slice %2 {offsets = [0, 19], sizes = [4, 1], strides = [1, 1]} : vector<4x23xf32> to vector<4x1xf32>
    %cst_18 = arith.constant 1.200000e+00 : f32
    %104 = vector.broadcast %cst_18 : f32 to vector<4x256xf32>
    %105 = arith.maximumf %8, %104 : vector<4x256xf32>
    %106 = vector.broadcast %103 : vector<4x1xf32> to vector<4x256xf32>
    %107 = arith.mulf %106, %105 : vector<4x256xf32>
    %108 = arith.addf %102, %107 : vector<4x256xf32>
    %109 = vector.extract_strided_slice %2 {offsets = [0, 20], sizes = [4, 1], strides = [1, 1]} : vector<4x23xf32> to vector<4x1xf32>
    %cst_19 = arith.constant 1.400000e+00 : f32
    %110 = vector.broadcast %cst_19 : f32 to vector<4x256xf32>
    %111 = arith.maximumf %8, %110 : vector<4x256xf32>
    %112 = vector.broadcast %109 : vector<4x1xf32> to vector<4x256xf32>
    %113 = arith.mulf %112, %111 : vector<4x256xf32>
    %114 = arith.addf %108, %113 : vector<4x256xf32>
    %115 = vector.extract_strided_slice %2 {offsets = [0, 21], sizes = [4, 1], strides = [1, 1]} : vector<4x23xf32> to vector<4x1xf32>
    %cst_20 = arith.constant 1.600000e+00 : f32
    %116 = vector.broadcast %cst_20 : f32 to vector<4x256xf32>
    %117 = arith.maximumf %8, %116 : vector<4x256xf32>
    %118 = vector.broadcast %115 : vector<4x1xf32> to vector<4x256xf32>
    %119 = arith.mulf %118, %117 : vector<4x256xf32>
    %120 = arith.addf %114, %119 : vector<4x256xf32>
    %121 = vector.extract_strided_slice %2 {offsets = [0, 22], sizes = [4, 1], strides = [1, 1]} : vector<4x23xf32> to vector<4x1xf32>
    %cst_21 = arith.constant 1.800000e+00 : f32
    %122 = vector.broadcast %cst_21 : f32 to vector<4x256xf32>
    %123 = arith.maximumf %8, %122 : vector<4x256xf32>
    %124 = vector.broadcast %121 : vector<4x1xf32> to vector<4x256xf32>
    %125 = arith.mulf %124, %123 : vector<4x256xf32>
    %126 = arith.addf %120, %125 : vector<4x256xf32>
    %127 = vector.broadcast %6 : vector<4x1xf32> to vector<4x256xf32>
    %128 = arith.mulf %126, %127 : vector<4x256xf32>
    %c0_22 = arith.constant 0 : index
    %c0_23 = arith.constant 0 : index
    %c0_24 = arith.constant 0 : index
    %129 = vector.load %arg5[%c0_22, %c0_23, %c0_24] : memref<1x4x256xf32, #tpu.memory_space<vmem>>, vector<1x4x256xf32>
    %130 = vector.shape_cast %129 : vector<1x4x256xf32> to vector<4x256xf32>
    %131 = vector.shape_cast %128 : vector<4x256xf32> to vector<1x4x256xf32>
    tpu.vector_store %arg5[%c0_22, %c0_23, %c0_24], %131 {strides = array<i32>} : memref<1x4x256xf32, #tpu.memory_space<vmem>>, vector<1x4x256xf32>,
    return
  }
  func.func @transform_0(%arg0: i32, %arg1: i32, %arg2: i32) -> (i32, i32, i32) {
    %c0_i32 = arith.constant 0 : i32
    return %arg0, %arg1, %arg2 : i32, i32, i32
  }
  func.func @transform_1(%arg0: i32, %arg1: i32, %arg2: i32) -> (i32, i32) {
    %c0_i32 = arith.constant 0 : i32
    %c0_i32_0 = arith.constant 0 : i32
    return %arg1, %c0_i32 : i32, i32
  }
  func.func @transform_2(%arg0: i32, %arg1: i32, %arg2: i32) -> (i32, i32, i32) {
    %c0_i32 = arith.constant 0 : i32
    return %arg0, %arg1, %arg2 : i32, i32, i32
  }
}

</mosaic_0001>

<bundles_post_ra>
// kernel: tpu_custom_call.1
= control target key start
LH: loop header
LB: loop body
LE: loop exit
PB: predicated region body
PF: predicated region fallthrough
CT: control target
= control target key end

     0   :  { %7 = vsyncpa [#allocation3], 0  ;;  %s1204_s0 = inlined_call_operand.hbm [shape: f32[2,4,256], index: 0, kind: input, shape index: {}]   ;;  %s1205_s1 = inlined_call_operand.hbm [shape: f32[4,23], index: 1, kind: input, shape index: {}]   ;;  %s1206_s2 = inlined_call_operand.hbm [shape: f32[2,4,256], index: 2, kind: output, shape index: {}]  }
   0x1   :  { %9 = vsyncpa [#allocation3 + $0x1], 0 }
   0x2   :  { %10 = vsyncpa [#allocation6], 0 }
   0x3   :  { %11 = vsyncpa [#allocation4], 0 }
   0x4   :  { %13 = vsyncpa [#allocation4 + $0x1], 0  ;;  %s932_s9 = smov 0   ;;  %s934_s10 = smov 0  }
   0x5   :  { %s936_s11 = smov 0   ;;  %s938_s12 = smov 0  }
   0x6   :  { %s940_s13 = smov 0   ;;  %s942_s14 = smov 0  }
   0x7 LB: > { %s604_s15 = sadd.s32 4294967295, %s888_s14   ;;  %s605_s16 = sadd.s32 4294967294, %s888_s14   ;;  %s888_s14 = sphi %s942_s14, %s19_s14   ;;  %s884_s13 = sphi %s940_s13, %s1231_s13   ;;  %s880_s12 = sphi %s938_s12, %s1230_s12   ;;  %s876_s11 = sphi %s936_s11, %s1229_s11   ;;  %s872_s10 = sphi %s934_s10, %s1228_s10   ;;  %s868_s9 = sphi %s932_s9, %s1227_s9  }
   0x8   : > { %p62_p0 = scmp.ne.s32.totalorder %s872_s10, %s868_s9  ;;  %p966_p1 = scmp.eq.s32.totalorder %s604_s15, 0 }
   0x9   : > { %p970_p2 = scmp.eq.s32.totalorder %s604_s15, 1  ;;  %p122_p3 = scmp.eq.s32.totalorder %s605_s16, 1 }
   0xa   : > { %s1211_s17 = scalar_select %p966_p1, 1, 0 }
   0xb   : > { %s1212_s18 = scalar_select %p970_p2, 1, 0 }
   0xc   : > { %p976_p4 = por %p966_p1, %p62_p0  ;;  %p606_p5 = scmp.ge.s32.totalorder %s888_s14, 1 }
   0xd   : > { %p981_p6 = por %p122_p3, %p62_p0  ;;  %p129_p7 = scmp.lt.s32.totalorder %s888_s14, 3 }
   0xe   : > { %s1213_s19 = scalar_select %p976_p4, 1, 0 }
   0xf   : > { %s1214_s20 = scalar_select %p981_p6, 1, 0 }
  0x10   : > { %p986_p8 = pnand %p606_p5, %p129_p7  ;;  %s890_s22 = smov [#allocation5]  }
  0x11   : > { %s144_s23 = sshll.u32 %s890_s22, 4  ;;  %s38_s25 = sadd.s32 1, %s884_s13  ;;  %s145_s23 = int_to_ptr.vmem [resolvable:$true] %s144_s23 }
  0x12   : > { %s1215_s21 = scalar_select %p986_p8, 1, 0 }
  0x13   : > { %p631_p10 = pneg %p986_p8  ;;  %s49_s26 = sadd.s32 1, %s876_s11 }
  0x14   : > { %p1001_p12 = scmp.ge.s32.totalorder %s38_s25, 2  ;;  %s744_s30 = scalar_lea.hbm %s1205_s1, 64 }
  0x15   : > { %p995_p11 = pnand %p631_p10, %p966_p1  ;;  %p745_p13 = scmp.ne.s32.totalorder %s1205_s1, %s744_s30 }
  0x16   : > { %s1217_s27 = scalar_select %p1001_p12, 1, 0 }
  0x17   : > { %p746_p0 = pneg %p995_p11  ;;  %p751_p7 = scmp.lt.u32.totalorder %s744_s30, %s1205_s1 }
  0x19   : > { %p747_p3 = pnand %p746_p0, %p745_p13 }
  0x1b   : > { %p748_p5 = pneg %p747_p3 }
  0x1d   : > { %p753_p10 = pnand %p751_p7, %p748_p5 }
  0x1f   : > { %756 = shalt.err (!%p753_p10)
}
  0x20   : > { %s757_s7 = scalar_lea.vmem %s145_s23, 64  ;;  %p765_p4 = scmp.lt.s32.totalorder %s145_s23, %s145_s23 }
  0x21   : > { %p758_p9 = scmp.ne.s32.totalorder %s145_s23, %s757_s7  ;;  %p766_p8 = scmp.lt.s32.totalorder %s757_s7, %s757_s7 }
  0x23   : > { %p760_p6 = pnand %p758_p9, %p746_p0  ;;  %p767_p2 = por %p766_p8, %p765_p4 }
  0x25   : > { %p761_p1 = pneg %p760_p6 }
  0x27   : > { %p768_p12 = pnand %p767_p2, %p761_p1 }
  0x29   : > { %771 = shalt.err (!%p768_p12)
}
  0x2a   : > { %634 = dma.hbm_to_vmem [thread:$0]  (!%p995_p11), %s1205_s1, 64, %s145_s23, [#allocation6]  }
  0x2b   : > { %p1218_p4 = scmp.ne.s32.totalorder %s1217_s27, 0  ;;  %p56_p1 = scmp.ne.s32.totalorder %s876_s11, %s872_s10 }
  0x2c   : > { %p57_p2 = scmp.eq.s32.totalorder %s888_s14, 0  ;;  %p644_p6 = scmp.lt.s32.totalorder %s888_s14, 2 }
  0x2d   : > { %s1233_s25 = smov (%p1218_p4, %s38_s25), 0  ;;  %p1219_p12 = scmp.ne.s32.totalorder %s1212_s18, 0 }
  0x2e   : > { %s42_s16 = ssub.s32 %s884_s13, %s1233_s25  ;;  %p58_p9 = por %p57_p2, %p56_p1 }
  0x2f   : > { %p47_p8 = scmp.eq.s32.totalorder %s42_s16, 0  ;;  %p1033_p13 = por %p1219_p12, %p56_p1 }
  0x30   : > { %s155_s24 = sand.u32 1, %s876_s11   ;;  %s621_s27 = sshll.u32 %s884_s13, 7 }
  0x31   : > { %s1041_s28 = scalar_select %p47_p8, %s876_s11, %s49_s26  }
  0x32   : > { %s609_s23 = sshll.u32 %s155_s24, 3  ;;  %s1047_s3 = scalar_lea.hbm %s1204_s0, %s621_s27 }
  0x33   : > { %s159_s18 = scalar_lea.vmem [#allocation2], %s609_s23  ;;  %p1051_p11 = pnand %p644_p6, %p58_p9 }
  0x34   : > { %s171_s4 = sshll.u32 %s159_s18, 4  ;;  %s156_s26 = scalar_lea.sflag [#allocation3], %s155_s24  ;;  %s1049_s4 = int_to_ptr.vmem [resolvable:$true] %s171_s4 }
  0x35   : > { %s772_s6 = scalar_lea.hbm %s1047_s3, 128  ;;  %p774_p3 = pneg %p1051_p11 }
  0x36   : > { %p773_p0 = scmp.ne.s32.totalorder %s1047_s3, %s772_s6  ;;  %s777_s15 = scalar_lea.hbm %s1204_s0, 256 }
  0x37   : > { %p778_p10 = scmp.lt.u32.totalorder %s1047_s3, %s1204_s0  ;;  %p779_p4 = scmp.lt.u32.totalorder %s777_s15, %s772_s6 }
  0x38   : > { %p775_p5 = pnand %p774_p3, %p773_p0  ;;  %p781_p2 = scmp.lt.u32.totalorder %s772_s6, %s1047_s3 }
  0x39   : > { %p780_p1 = por %p779_p4, %p778_p10 }
  0x3a   : > { %p776_p7 = pneg %p775_p5 }
  0x3b   : > { %p782_p6 = por %p781_p2, %p780_p1 }
  0x3d   : > { %p783_p8 = pnand %p782_p6, %p776_p7 }
  0x3f   : > { %786 = shalt.err (!%p783_p8)
}
  0x40   : > { %s787_s24 = scalar_lea.vmem %s1049_s4, 128  ;;  %s891_s27 = smov [#allocation2]  }
  0x41   : > { %p788_p9 = scmp.ne.s32.totalorder %s1049_s4, %s787_s24  ;;  %s792_s29 = sshll.u32 %s891_s27, 4  ;;  %s793_s29 = int_to_ptr.vmem [resolvable:$false] %s792_s29 }
  0x42   : > { %s794_s30 = scalar_lea.vmem %s793_s29, 256  ;;  %p795_p5 = scmp.lt.s32.totalorder %s1049_s4, %s793_s29 }
  0x43   : > { %p790_p12 = pnand %p788_p9, %p774_p3  ;;  %p796_p10 = scmp.lt.s32.totalorder %s794_s30, %s787_s24 }
  0x45   : > { %p791_p0 = pneg %p790_p12  ;;  %p797_p4 = por %p796_p10, %p795_p5 }
  0x47   : > { %p798_p1 = pnand %p797_p4, %p791_p0 }
  0x49   : > { %801 = shalt.err (!%p798_p1)
}
  0x4a   : > { %638 = dma.hbm_to_vmem [thread:$0]  (!%p1051_p11), %s1047_s3, 128, %s1049_s4, %s156_s26  }
  0x4b   : > { %p1222_p7 = scmp.ne.s32.totalorder %s1215_s21, 0 }
  0x4c   : > { %s1083_s18 = sand.u32 (!%p1222_p7), 1, %s872_s10   ;;  %p1223_p3 = scmp.ne.s32.totalorder (!%p1222_p7), %s1213_s19, 0 }
  0x4d   : > { %180 = sbr.rel (%p1222_p7) target bundleno = 306 (0x132), region = 28  ;;  %s613_s6 = sshll.u32 (!%p1222_p7), %s1083_s18, 3 }
  0x4e   : > { %s183_s7 = scalar_lea.sflag (!%p1222_p7), [#allocation3], %s1083_s18  ;;  %s1089_s8 = scalar_lea.vmem (!%p1222_p7), [#allocation2], %s613_s6 }
  0x54   : > { %855 = dma.done.wait (%p1223_p3), %s183_s7, 128  }
  0x55   : > { %857 = vsyncadd (%p1223_p3), %s183_s7, 4294967168  ;;  %p1224_p11 = scmp.ne.s32.totalorder %s1211_s17, 0 }
  0x57   : > { %859 = dma.done.wait (%p1224_p11), [#allocation6], 64  }
  0x58   : > { %861 = vsyncadd (%p1224_p11), [#allocation6], 4294967232  ;;  %v892_v0 = vmov 0   ;;  %v893_v1 = vmov 2   ;;  %v1099_v2 = vld [vmem:[#allocation5] sm:$0xf]  ;;  %v222_v26 = vlaneseq }
  0x59   : > { %722 = vset.pattern.permute.xlu1 %v892_v0  ;;  %720 = vset.pattern.permute.xlu0 %v893_v1  ;;  %v894_v3 = vmov 4   ;;  %v895_v4 = vmov 1   ;;  %v896_v5 = vmov 5   ;;  %v897_v6 = vmov 6   ;;  %v213_v30 = vld [vmem:[%s1089_s8] sm:$0xff]  ;;  %s622_s17 = sshll.u32 %s880_s12, 7 }
  0x5a   : > { %238 = vperm.xlu1 %722, %v1099_v2   ;;  %217 = vperm.xlu0 %720, %v1099_v2   ;;  %v898_v7 = vmov 7   ;;  %v899_v8 = vmov 9   ;;  %v900_v9 = vmov 8   ;;  %v901_v10 = vmov 12   ;;  %s210_s19 = scalar_lea.vmem [#allocation7], %s613_s6  ;;  %s1155_s5 = scalar_lea.hbm %s1206_s2, %s622_s17 }
  0x5b   : > { %v902_v11 = vmov 10   ;;  %v903_v12 = vmov 15   ;;  %v904_v13 = vmov 11   ;;  %v905_v14 = vmov 18   ;;  %s501_s21 = sshll.u32 %s210_s19, 4  ;;  %s483_s26 = scalar_lea.sflag [#allocation4], %s1083_s18  ;;  %s1157_s21 = int_to_ptr.vmem [resolvable:$true] %s501_s21 }
  0x5c   : > { %v906_v15 = vmov 13   ;;  %v907_v16 = vmov 21   ;;  %v908_v17 = vmov 14   ;;  %v909_v18 = vmov 3   ;;  %s802_s15 = scalar_lea.vmem %s1157_s21, 128  ;;  %s916_s12 = smov [#allocation7]  }
  0x5d   : > { %v910_v19 = vmov 16   ;;  %v911_v20 = vmov 17   ;;  %v912_v21 = vmov 19   ;;  %v913_v22 = vmov 20   ;;  %p803_p2 = scmp.ne.s32.totalorder %s1157_s21, %s802_s15  ;;  %s806_s16 = sshll.u32 %s916_s12, 4  ;;  %s807_s16 = int_to_ptr.vmem [resolvable:$false] %s806_s16 }
  0x5e   : > { %723 = vset.pattern.permute.xlu1 %v894_v3  ;;  %721 = vset.pattern.permute.xlu0 %v895_v4  ;;  %v914_v23 = vmov 22   ;;  %v915_v24 = vmov 839922192   ;;  %v223_v28 = vshrl.u32 %v222_v26, 7  ;;  %s808_s23 = scalar_lea.vmem %s807_s16, 256  ;;  %p809_p9 = scmp.lt.s32.totalorder %s1157_s21, %s807_s16 }
  0x5f   : > { %245 = vperm.xlu1 %723, %v1099_v2   ;;  %229 = vperm.xlu0 %721, %v1099_v2   ;;  %v220_v25 = vunpack.c.l.s4 %v915_v24  ;;  %p804_p6 = pnand %p803_p2, %p1033_p13  ;;  %p810_p12 = scmp.lt.s32.totalorder %s808_s23, %s802_s15 }
  0x61   : > { %v221_v27 = vunpack.c.0.s8 %v220_v25  ;;  %p805_p8 = pneg %p804_p6  ;;  %p811_p0 = por %p810_p12, %p809_p9 }
  0x63   : > { %724 = vset.pattern.permute.xlu1 %v896_v5  ;;  %725 = vset.pattern.permute.xlu0 %v897_v6  ;;  %v224_v29 = vsub.s32 %v221_v27, %v223_v28  ;;  %p812_p5 = pnand %p811_p0, %p805_p8 }
  0x64   : > { %257 = vperm.xlu1 %724, %v1099_v2   ;;  %269 = vperm.xlu0 %725, %v1099_v2  }
  0x68   : > { %726 = vset.pattern.permute.xlu1 %v898_v7  ;;  %728 = vset.pattern.permute.xlu0 %v899_v8 }
  0x69   : > { %281 = vperm.xlu1 %726, %v1099_v2   ;;  %305 = vperm.xlu0 %728, %v1099_v2  }
  0x6d   : > { %727 = vset.pattern.permute.xlu1 %v900_v9  ;;  %731 = vset.pattern.permute.xlu0 %v901_v10 }
  0x6e   : > { %293 = vperm.xlu1 %727, %v1099_v2   ;;  %341 = vperm.xlu0 %731, %v1099_v2  }
  0x72   : > { %729 = vset.pattern.permute.xlu1 %v902_v11  ;;  %734 = vset.pattern.permute.xlu0 %v903_v12 }
  0x73   : > { %317 = vperm.xlu1 %729, %v1099_v2   ;;  %377 = vperm.xlu0 %734, %v1099_v2  }
  0x77   : > { %730 = vset.pattern.permute.xlu1 %v904_v13  ;;  %737 = vset.pattern.permute.xlu0 %v905_v14 }
  0x78   : > { %329 = vperm.xlu1 %730, %v1099_v2   ;;  %413 = vperm.xlu0 %737, %v1099_v2  }
  0x7c   : > { %732 = vset.pattern.permute.xlu1 %v906_v15  ;;  %740 = vset.pattern.permute.xlu0 %v907_v16 }
  0x7d   : > { %353 = vperm.xlu1 %732, %v1099_v2   ;;  %449 = vperm.xlu0 %740, %v1099_v2  }
  0x81   : > { %733 = vset.pattern.permute.xlu1 %v908_v17  ;;  %743 = vset.pattern.permute.xlu0 %v909_v18 }
  0x82   : > { %365 = vperm.xlu1 %733, %v1099_v2  }
  0x86   : > { %735 = vset.pattern.permute.xlu1 %v910_v19 }
  0x87   : > { %389 = vperm.xlu1 %735, %v1099_v2  }
  0x8b   : > { %736 = vset.pattern.permute.xlu1 %v911_v20 }
  0x8c   : > { %401 = vperm.xlu1 %736, %v1099_v2  }
  0x90   : > { %738 = vset.pattern.permute.xlu1 %v912_v21 }
  0x91   : > { %425 = vperm.xlu1 %738, %v1099_v2  }
  0x95   : > { %739 = vset.pattern.permute.xlu1 %v913_v22 }
  0x96   : > { %437 = vperm.xlu1 %739, %v1099_v2  }
  0x9a   : > { %741 = vset.pattern.permute.xlu1 %v914_v23 }
  0x9b   : > { %461 = vperm.xlu1 %741, %v1099_v2  }
  0x9f   : > { %742 = vset.pattern.permute.xlu1 %v909_v18 }
  0xa0   : > { %472 = vperm.xlu1 %742, %v1099_v2  }
  0xd9   : > { %v239_v31 = vpop.permute.xlu1 %238  ;;  %v218_v32 = vpop.permute.xlu0 %217 }
  0xda   : > { %v225_v33 = vrot.slane %v218_v32, %v224_v29 }
  0xdc   : > { %v1125_v34 = vmul.f32 %v225_v33, %v213_v30 }
  0xde   : > { %v246_v35 = vpop.permute.xlu1 %245  ;;  %v243_v36 = vmax.f32 %v1125_v34, -1.8  ;;  %v230_v37 = vpop.permute.xlu0 %229  ;;  %v233_v38 = vcombine.high %v1125_v34, %v1125_v34  ;;  %v255_v39 = vmax.f32 %v1125_v34, -1.6  ;;  %v267_v40 = vmax.f32 %v1125_v34, -1.4 }
  0xdf   : > { %v235_v41 = vmul.f32 %v230_v37, %v1125_v34  ;;  %v279_v47 = vmax.f32 %v1125_v34, -1.2  ;;  %v291_v58 = vmax.f32 %v1125_v34, -1.0  ;;  %v303_v0 = vmax.f32 %v1125_v34, -0.8 }
  0xe0   : > { %v249_v42 = vcombine.high %v243_v36, %v243_v36  ;;  %v251_v43 = vmul.f32 %v246_v35, %v243_v36  ;;  %v236_v44 = vmul.f32 %v233_v38, %v230_v37  ;;  %v261_v45 = vcombine.high %v255_v39, %v255_v39 }
  0xe1   : > { %v241_v46 = vadd.f32 %v239_v31, %v235_v41  ;;  %v273_v50 = vcombine.high %v267_v40, %v267_v40  ;;  %v285_v57 = vcombine.high %v279_v47, %v279_v47  ;;  %v297_v1 = vcombine.high %v291_v58, %v291_v58 }
  0xe2   : > { %v252_v48 = vmul.f32 %v249_v42, %v246_v35  ;;  %v242_v49 = vadd.f32 %v239_v31, %v236_v44  ;;  %v315_v6 = vmax.f32 %v1125_v34, -0.6  ;;  %v309_v7 = vcombine.high %v303_v0, %v303_v0 }
  0xe3   : > { %v258_v51 = vpop.permute.xlu1 %257  ;;  %v253_v52 = vadd.f32 %v251_v43, %v241_v46  ;;  %v270_v53 = vpop.permute.xlu0 %269  ;;  %v327_v15 = vmax.f32 %v1125_v34, -0.4  ;;  %v339_v21 = vmax.f32 %v1125_v34, -0.2  ;;  %v351_v29 = vmax.f32 %v1125_v34, 0.0 }
  0xe4   : > { %v254_v54 = vadd.f32 %v252_v48, %v242_v49  ;;  %v263_v55 = vmul.f32 %v258_v51, %v255_v39  ;;  %v264_v56 = vmul.f32 %v261_v45, %v258_v51  ;;  %v275_v61 = vmul.f32 %v270_v53, %v267_v40 }
  0xe5   : > { %v276_v62 = vmul.f32 %v273_v50, %v270_v53  ;;  %v321_v14 = vcombine.high %v315_v6, %v315_v6  ;;  %v333_v22 = vcombine.high %v327_v15, %v327_v15  ;;  %v345_v27 = vcombine.high %v339_v21, %v339_v21 }
  0xe6   : > { %v265_v59 = vadd.f32 %v263_v55, %v253_v52  ;;  %v266_v60 = vadd.f32 %v264_v56, %v254_v54  ;;  %v357_v41 = vcombine.high %v351_v29, %v351_v29  ;;  %v363_v42 = vmax.f32 %v1125_v34, 0.2 }
  0xe7   : > { %v375_v43 = vmax.f32 %v1125_v34, 0.4  ;;  %v387_v51 = vmax.f32 %v1125_v34, 0.6 }
  0xe8   : > { %v282_v63 = vpop.permute.xlu1 %281  ;;  %v277_v2 = vadd.f32 %v275_v61, %v265_v59  ;;  %v278_v3 = vadd.f32 %v276_v62, %v266_v60  ;;  %v306_v13 = vpop.permute.xlu0 %305  ;;  %v369_v48 = vcombine.high %v363_v42, %v363_v42 }
  0xe9   : > { %v287_v4 = vmul.f32 %v282_v63, %v279_v47  ;;  %v288_v5 = vmul.f32 %v285_v57, %v282_v63  ;;  %v311_v16 = vmul.f32 %v306_v13, %v303_v0  ;;  %v312_v17 = vmul.f32 %v309_v7, %v306_v13 }
  0xea   : > { %v381_v49 = vcombine.high %v375_v43, %v375_v43  ;;  %v393_v62 = vcombine.high %v387_v51, %v387_v51  ;;  %v399_v63 = vmax.f32 %v1125_v34, 0.8  ;;  %v411_v0 = vmax.f32 %v1125_v34, 1.0 }
  0xeb   : > { %v289_v9 = vadd.f32 %v287_v4, %v277_v2  ;;  %v290_v10 = vadd.f32 %v288_v5, %v278_v3 }
  0xec   : > { %v405_v5 = vcombine.high %v399_v63, %v399_v63 }
  0xed   : > { %v294_v8 = vpop.permute.xlu1 %293  ;;  %v342_v37 = vpop.permute.xlu0 %341 }
  0xee   : > { %v299_v11 = vmul.f32 %v294_v8, %v291_v58  ;;  %v300_v12 = vmul.f32 %v297_v1, %v294_v8  ;;  %v347_v38 = vmul.f32 %v342_v37, %v339_v21  ;;  %v348_v39 = vmul.f32 %v345_v27, %v342_v37 }
  0xef   : > { %v423_v8 = vmax.f32 %v1125_v34, 1.2  ;;  %v447_v21 = vmax.f32 %v1125_v34, 1.6 }
  0xf0   : > { %v301_v18 = vadd.f32 %v299_v11, %v289_v9  ;;  %v302_v19 = vadd.f32 %v300_v12, %v290_v10 }
  0xf2   : > { %v318_v20 = vpop.permute.xlu1 %317  ;;  %v313_v23 = vadd.f32 %v311_v16, %v301_v18  ;;  %v314_v24 = vadd.f32 %v312_v17, %v302_v19  ;;  %v378_v58 = vpop.permute.xlu0 %377  ;;  %v429_v19 = vcombine.high %v423_v8, %v423_v8 }
  0xf3   : > { %v323_v25 = vmul.f32 %v318_v20, %v315_v6  ;;  %v324_v26 = vmul.f32 %v321_v14, %v318_v20  ;;  %v383_v59 = vmul.f32 %v378_v58, %v375_v43  ;;  %v384_v60 = vmul.f32 %v381_v49, %v378_v58 }
  0xf4   : > { %v417_v6 = vcombine.high %v411_v0, %v411_v0  ;;  %v435_v20 = vmax.f32 %v1125_v34, 1.4 }
  0xf5   : > { %v325_v30 = vadd.f32 %v323_v25, %v313_v23  ;;  %v326_v31 = vadd.f32 %v324_v26, %v314_v24 }
  0xf6   : > { %v441_v26 = vcombine.high %v435_v20, %v435_v20 }
  0xf7   : > { %v330_v28 = vpop.permute.xlu1 %329  ;;  %v414_v13 = vpop.permute.xlu0 %413 }
  0xf8   : > { %v335_v32 = vmul.f32 %v330_v28, %v327_v15  ;;  %v336_v33 = vmul.f32 %v333_v22, %v330_v28  ;;  %v419_v16 = vmul.f32 %v414_v13, %v411_v0  ;;  %v420_v17 = vmul.f32 %v417_v6, %v414_v13 }
  0xf9   : > { %v453_v28 = vcombine.high %v447_v21, %v447_v21 }
  0xfa   : > { %v337_v35 = vadd.f32 %v335_v32, %v325_v30  ;;  %v338_v36 = vadd.f32 %v336_v33, %v326_v31  ;;  %v459_v30 = vmax.f32 %v1125_v34, 1.8 }
  0xfc   : > { %v354_v40 = vpop.permute.xlu1 %353  ;;  %v349_v44 = vadd.f32 %v347_v38, %v337_v35  ;;  %v350_v45 = vadd.f32 %v348_v39, %v338_v36  ;;  %v450_v27 = vpop.permute.xlu0 %449 }
  0xfd   : > { %v359_v46 = vmul.f32 %v354_v40, %v351_v29  ;;  %v360_v47 = vmul.f32 %v357_v41, %v354_v40  ;;  %v455_v36 = vmul.f32 %v450_v27, %v447_v21  ;;  %v456_v37 = vmul.f32 %v453_v28, %v450_v27 }
  0xfe   : > { %v465_v40 = vcombine.high %v459_v30, %v459_v30 }
  0xff   : > { %v361_v52 = vadd.f32 %v359_v46, %v349_v44  ;;  %v362_v53 = vadd.f32 %v360_v47, %v350_v45 }
 0x101   : > { %v366_v50 = vpop.permute.xlu1 %365 }
 0x102   : > { %v371_v54 = vmul.f32 %v366_v50, %v363_v42  ;;  %v372_v55 = vmul.f32 %v369_v48, %v366_v50 }
 0x104   : > { %v373_v56 = vadd.f32 %v371_v54, %v361_v52  ;;  %v374_v57 = vadd.f32 %v372_v55, %v362_v53 }
 0x106   : > { %v390_v61 = vpop.permute.xlu1 %389  ;;  %v385_v1 = vadd.f32 %v383_v59, %v373_v56  ;;  %v386_v2 = vadd.f32 %v384_v60, %v374_v57 }
 0x107   : > { %v395_v3 = vmul.f32 %v390_v61, %v387_v51  ;;  %v396_v4 = vmul.f32 %v393_v62, %v390_v61 }
 0x109   : > { %v397_v9 = vadd.f32 %v395_v3, %v385_v1  ;;  %v398_v10 = vadd.f32 %v396_v4, %v386_v2 }
 0x10b   : > { %v402_v7 = vpop.permute.xlu1 %401 }
 0x10c   : > { %v407_v11 = vmul.f32 %v402_v7, %v399_v63  ;;  %v408_v12 = vmul.f32 %v405_v5, %v402_v7 }
 0x10e   : > { %v409_v14 = vadd.f32 %v407_v11, %v397_v9  ;;  %v410_v15 = vadd.f32 %v408_v12, %v398_v10 }
 0x110   : > { %v426_v18 = vpop.permute.xlu1 %425  ;;  %v421_v22 = vadd.f32 %v419_v16, %v409_v14  ;;  %v422_v23 = vadd.f32 %v420_v17, %v410_v15 }
 0x111   : > { %v431_v24 = vmul.f32 %v426_v18, %v423_v8  ;;  %v432_v25 = vmul.f32 %v429_v19, %v426_v18 }
 0x113   : > { %v433_v31 = vadd.f32 %v431_v24, %v421_v22  ;;  %v434_v32 = vadd.f32 %v432_v25, %v422_v23 }
 0x115   : > { %v438_v29 = vpop.permute.xlu1 %437 }
 0x116   : > { %v443_v33 = vmul.f32 %v438_v29, %v435_v20  ;;  %v444_v35 = vmul.f32 %v441_v26, %v438_v29 }
 0x118   : > { %v445_v38 = vadd.f32 %v443_v33, %v433_v31  ;;  %v446_v39 = vadd.f32 %v444_v35, %v434_v32 }
 0x11a   : > { %v462_v41 = vpop.permute.xlu1 %461  ;;  %v457_v42 = vadd.f32 %v455_v36, %v445_v38  ;;  %v458_v43 = vadd.f32 %v456_v37, %v446_v39 }
 0x11b   : > { %v467_v44 = vmul.f32 %v462_v41, %v459_v30  ;;  %v468_v45 = vmul.f32 %v465_v40, %v462_v41 }
 0x11d   : > { %v469_v46 = vadd.f32 %v467_v44, %v457_v42  ;;  %v470_v34 = vadd.f32 %v468_v45, %v458_v43 }
 0x11f   : > { %v473_v47 = vpop.permute.xlu1 %472 }
 0x120   : > { %v475_v48 = vmul.f32 %v473_v47, %v469_v46  ;;  %v476_v49 = vmul.f32 %v473_v47, %v470_v34 }
 0x122   : > { %v479_v50 = vcombine.low %v475_v48, %v476_v49 }
 0x124   : > { %481 = vst [vmem:[%s210_s19] sm:$0xff] %v479_v50 }
 0x125   : > { %815 = shalt.err (!%p812_p5)
}
 0x126   : > { %s816_s24 = scalar_lea.hbm %s1155_s5, 128  ;;  %s820_s30 = scalar_lea.hbm %s1206_s2, 256 }
 0x127   : > { %p817_p10 = scmp.ne.s32.totalorder %s1155_s5, %s816_s24  ;;  %p821_p7 = scmp.lt.u32.totalorder %s1155_s5, %s1206_s2 }
 0x128   : > { %p822_p3 = scmp.lt.u32.totalorder %s820_s30, %s816_s24  ;;  %p824_p2 = scmp.lt.u32.totalorder %s816_s24, %s1155_s5 }
 0x129   : > { %p818_p4 = pnand %p817_p10, %p1033_p13 }
 0x12a   : > { %p823_p11 = por %p822_p3, %p821_p7 }
 0x12b   : > { %p819_p1 = pneg %p818_p4 }
 0x12c   : > { %p825_p6 = por %p824_p2, %p823_p11 }
 0x12e   : > { %p826_p8 = pnand %p825_p6, %p819_p1 }
 0x130   : > { %829 = shalt.err (!%p826_p8)
}
 0x131   : > { %629 = dma.vmem_to_hbm [thread:$0]  (%p1033_p13), %s1157_s21, 128, %s1155_s5, %s483_s26  }
 0x132 PF: > { %s513_s7 = sand.u32 1, %s868_s9   ;;  %p1225_p9 = scmp.ne.s32.totalorder %s1214_s20, 0 }
 0x133   : > { %p1226_p12 = scmp.ge.s32.totalorder %s888_s14, 2  ;;  %s514_s8 = scalar_lea.sflag [#allocation4], %s513_s7 }
 0x135   : > { %p640_p0 = pnand %p1226_p12, %p1225_p9 }
 0x137   : > { %863 = dma.done.wait (!%p640_p0), %s514_s8, 128  }
 0x138   : > { %865 = vsyncadd (!%p640_p0), %s514_s8, 4294967168  ;;  %s19_s14 = sadd.s32 1, %s888_s14   ;;  %s1227_s9 = smov %s872_s10 }
 0x139   : > { %p16_p5 = scmp.ge.s32.totalorder %s19_s14, 4   ;;  %s1228_s10 = smov %s876_s11 }
 0x13a   : > { %s1229_s11 = smov %s1041_s28  ;;  %s1230_s12 = smov %s884_s13 }
 0x13b   : > { %s1231_s13 = smov %s1233_s25  ;;  %18 = sbr.rel (!%p16_p5) target bundleno = 7 (0x7), region = 78 }
 0x142   :  { %519 = vsyncpa [#allocation3], 1 }
 0x143   :  { %521 = vsyncpa [#allocation3 + $0x1], 1 }
 0x144   :  { %522 = vsyncpa [#allocation6], 1 }
 0x145   :  { %523 = vsyncpa [#allocation4], 1 }
 0x146   :  { %525 = vsyncpa [#allocation4 + $0x1], 1 }

</bundles_post_ra>
